<compile_context>
chip_gen: v5e
topology: v5e:2x2
jax: 0.10.0
libtpu: 0.0.40
codegen_flags: <defaults>
</compile_context>

<pallas_src>
import math
from typing import NamedTuple, Optional

import jax
import jax.numpy as jnp
from jax.experimental import pallas as pl
from jax.experimental.pallas import tpu as pltpu


def _round_up(x: int, m: int) -> int:
    return ((x + m - 1) // m) * m


# ---------------------------------------------------------------------------
# Kernel: canonical MK x KN matmul with an f32 VMEM accumulator; bias is added
# in f32 at the last K step.  No transposes / XLU work in the hot loop.
# ---------------------------------------------------------------------------
def _linear_kernel(x_ref, w_ref, b_ref, o_ref, acc_ref):
    # x_ref:   (tm, tk)  bf16 activations
    # w_ref:   (tk, tn)  bf16 weight, already in (in, out) layout
    # b_ref:   (1,  tn)  f32 bias row
    # o_ref:   (tm, tn)  output tile
    # acc_ref: (tm, tn)  f32 accumulator (persists across the K grid axis)
    k = pl.program_id(2)

    @pl.when(k == 0)
    def _():
        acc_ref[...] = jnp.zeros_like(acc_ref)

    acc_ref[...] += jnp.dot(x_ref[...], w_ref[...],
                            preferred_element_type=jnp.float32)

    @pl.when(k == pl.num_programs(2) - 1)
    def _():
        o_ref[...] = (acc_ref[...] + b_ref[...]).astype(o_ref.dtype)


# ---------------------------------------------------------------------------
# One-time parameter re-layout (transpose -> (in,out), bf16 cast, zero-pad to
# lane/sublane-friendly multiples).  Do this once per layer and reuse.
# ---------------------------------------------------------------------------
class PreparedLinear(NamedTuple):
    w_t: jax.Array     # (k_pad, n_pad) compute dtype (bf16), (in, out) layout
    bias: jax.Array    # (1, n_pad) float32
    in_dim: int
    out_dim: int
    tn: int
    tk: int


def prepare_linear_norm_params(weight, bias=None, *, tn=512, tk=1024,
                               param_dtype=jnp.bfloat16) -> PreparedLinear:
    """weight: (out_dim, in_dim) PyTorch layout; bias: (out_dim,) or None."""
    out_dim, in_dim = weight.shape
    tn = _round_up(min(tn, _round_up(out_dim, 128)), 128)
    tk = _round_up(min(tk, _round_up(in_dim, 128)), 128)
    n_pad = _round_up(out_dim, tn)
    k_pad = _round_up(in_dim, tk)

    w_t = jnp.zeros((k_pad, n_pad), param_dtype)
    w_t = w_t.at[:in_dim, :out_dim].set(weight.T.astype(param_dtype))
    b = jnp.zeros((1, n_pad), jnp.float32)
    if bias is not None:
        b = b.at[0, :out_dim].set(bias.astype(jnp.float32))
    return PreparedLinear(w_t, b, in_dim, out_dim, tn, tk)


# ---------------------------------------------------------------------------
# Forward: y = x @ weight.T + bias  (torch.nn.Linear semantics).
# ---------------------------------------------------------------------------
def linear_norm_forward(x, weight=None, bias=None, *, prepared: Optional[PreparedLinear] = None,
                        tm=512, out_dtype=None, force_kernel=False,
                        kernel_flop_threshold=1 << 22):
    if prepared is None:
        # Convenience path; prefer caching prepare_linear_norm_params yourself
        # so the transpose/pad/cast is not repeated every call.
        prepared = prepare_linear_norm_params(weight, bias)
    in_dim, out_dim = prepared.in_dim, prepared.out_dim
    assert x.shape[-1] == in_dim, "x last dim must equal in_dim"

    lead_shape = x.shape[:-1]
    m = math.prod(lead_shape) if lead_shape else 1
    out_dtype = jnp.dtype(out_dtype or x.dtype)
    compute_dtype = prepared.w_t.dtype

    x2d = x.reshape(m, in_dim).astype(compute_dtype)

    # --- small-problem fast path: single-tile problems are pure launch/pad
    #     overhead in Pallas; XLA's fused dot is strictly faster there. -------
    flops = 2 * m * in_dim * out_dim
    if not force_kernel and flops < kernel_flop_threshold:
        y = jnp.dot(x2d, prepared.w_t[:in_dim, :out_dim],
                    preferred_element_type=jnp.float32)
        y = (y + prepared.bias[:, :out_dim]).astype(out_dtype)
        return y.reshape(*lead_shape, out_dim)

    tn, tk = prepared.tn, prepared.tk
    k_pad, n_pad = prepared.w_t.shape

    # tm must be a multiple of 16 (bf16 sublane packing), clipped to problem.
    tm = _round_up(min(tm, _round_up(m, 16)), 16)

    # Only K needs *physical* zero padding (garbage in the K tail would
    # accumulate into real outputs).  The ragged final M block is handled by
    # masked loads/stores of the non-divisible grid — no activation copy.
    if k_pad != in_dim:
        x2d = jnp.pad(x2d, ((0, 0), (0, k_pad - in_dim)))

    gm = pl.cdiv(m, tm)
    gn = n_pad // tn
    gk = k_pad // tk

    # Ensure a dual-TC / megacore chip has >= 2 parallel (M,N) tiles to shard.
    if gm * gn == 1 and n_pad > 128:
        for cand in range(tn - 128, 0, -128):
            if n_pad % cand == 0:
                tn, gn = cand, n_pad // cand
                break

    grid = (gm, gn, gk)

    # VMEM budget: f32 accumulator + double-buffered ins/outs.  Only raise the
    # scoped limit when a big-tile config needs it (cap at 64 MiB for v7x).
    itemsize_c = jnp.dtype(compute_dtype).itemsize
    vmem_est = (tm * tn * 4
                + 2 * (tm * tk + tk * tn) * itemsize_c
                + 2 * tn * 4
                + 2 * tm * tn * out_dtype.itemsize)
    vmem_limit = None
    if vmem_est > (30 << 20):
        vmem_limit = min(int(vmem_est * 1.25) + (4 << 20), 64 << 20)

    # Cost estimate counts HBM revisits (x re-read per N tile, w per M tile).
    bytes_accessed = (gn * m * k_pad * itemsize_c
                      + gm * k_pad * n_pad * itemsize_c
                      + gm * n_pad * 4
                      + m * n_pad * out_dtype.itemsize)
    cost = pl.CostEstimate(flops=flops, transcendentals=0,
                           bytes_accessed=bytes_accessed)

    out = pl.pallas_call(
        _linear_kernel,
        out_shape=jax.ShapeDtypeStruct((m, n_pad), out_dtype),
        grid_spec=pltpu.PrefetchScalarGridSpec(
            num_scalar_prefetch=0,
            grid=grid,
            in_specs=[
                pl.BlockSpec((tm, tk), lambda i, j, k: (i, k)),   # x   (M, K)
                pl.BlockSpec((tk, tn), lambda i, j, k: (k, j)),   # w_t (K, N)
                pl.BlockSpec((1, tn), lambda i, j, k: (0, j)),    # bias
            ],
            out_specs=pl.BlockSpec((tm, tn), lambda i, j, k: (i, j)),
            scratch_shapes=[pltpu.VMEM((tm, tn), jnp.float32)],
        ),
        compiler_params=pltpu.CompilerParams(
            dimension_semantics=("parallel", "parallel", "arbitrary"),
            vmem_limit_bytes=vmem_limit),
        cost_estimate=cost,
    )(x2d, prepared.w_t, prepared.bias)

    out = out[:, :out_dim]
    return out.reshape(*lead_shape, out_dim)


def init_linear_norm_params(key, in_dim, out_dim, w_init_gain="linear"):
    """xavier_uniform weight (gain('linear') == 1.0), nn.Linear-style bias."""
    gain = 1.0  # torch.nn.init.calculate_gain('linear') == 1.0
    k_w, k_b = jax.random.split(key)
    bound_w = gain * math.sqrt(6.0 / (in_dim + out_dim))
    weight = jax.random.uniform(k_w, (out_dim, in_dim),
                                minval=-bound_w, maxval=bound_w,
                                dtype=jnp.float32)
    bound_b = 1.0 / math.sqrt(in_dim)
    bias = jax.random.uniform(k_b, (out_dim,),
                              minval=-bound_b, maxval=bound_b,
                              dtype=jnp.float32)
    return weight, bias


if __name__ == "__main__":
    key = jax.random.PRNGKey(0)
    k_x1, k_p1, k_x2, k_p2, k_x3, k_p3 = jax.random.split(key, 6)

    # --- test 1: tiny module-typical shapes; fast path AND forced kernel ----
    batch, seq, in_dim, out_dim = 2, 8, 32, 64
    x1 = jax.random.normal(k_x1, (batch, seq, in_dim), dtype=jnp.float32)
    w1, b1 = init_linear_norm_params(k_p1, in_dim, out_dim)
    prep1 = prepare_linear_norm_params(w1, b1)

    y1_fast = linear_norm_forward(x1, prepared=prep1)                  # XLA path
    y1_kern = linear_norm_forward(x1, prepared=prep1, force_kernel=True)
    jax.block_until_ready((y1_fast, y1_kern))

    xb1 = x1.astype(jnp.bfloat16).astype(jnp.float32)
    wb1 = w1.astype(jnp.bfloat16).astype(jnp.float32)
    y1_ref = jnp.dot(xb1, wb1.T, precision="highest") + b1
    assert y1_kern.shape == (batch, seq, out_dim)
    assert jnp.allclose(y1_kern, y1_ref, atol=2e-3, rtol=2e-3)
    assert jnp.allclose(y1_fast, y1_ref, atol=2e-3, rtol=2e-3)
    # loose sanity vs full-f32 reference (difference = bf16 input rounding only)
    y1_f32 = jnp.dot(x1, w1.T, precision="highest") + b1
    assert jnp.allclose(y1_kern, y1_f32, atol=1e-1, rtol=1e-1)

    # --- test 2: multi-tile grid, ragged M (no physical M padding), K accum --
    b2, s2, din2, dout2 = 2, 40, 256, 384          # m = 80, tm = 64 -> ragged
    x2 = jax.random.normal(k_x2, (b2, s2, din2), dtype=jnp.float32)
    w2, bb2 = init_linear_norm_params(k_p2, din2, dout2)
    prep2 = prepare_linear_norm_params(w2, bb2, tn=128, tk=128)
    y2 = linear_norm_forward(x2, prepared=prep2, tm=64, force_kernel=True)
    jax.block_until_ready(y2)
    xb2 = x2.astype(jnp.bfloat16).astype(jnp.float32)
    wb2 = w2.astype(jnp.bfloat16).astype(jnp.float32)
    y2_ref = jnp.dot(xb2, wb2.T, precision="highest") + bb2
    assert y2.shape == (b2, s2, dout2)
    assert jnp.allclose(y2, y2_ref, atol=2e-3, rtol=2e-3)

    # --- test 3: default tiles, auto kernel path, N split for dual-TC chips --
    b3, s3, din3, dout3 = 4, 64, 512, 256
    x3 = jax.random.normal(k_x3, (b3, s3, din3), dtype=jnp.float32)
    w3, bb3 = init_linear_norm_params(k_p3, din3, dout3)
    prep3 = prepare_linear_norm_params(w3, bb3)
    y3 = linear_norm_forward(x3, prepared=prep3)
    jax.block_until_ready(y3)
    xb3 = x3.astype(jnp.bfloat16).astype(jnp.float32)
    wb3 = w3.astype(jnp.bfloat16).astype(jnp.float32)
    y3_ref = jnp.dot(xb3, wb3.T, precision="highest") + bb3
    assert y3.shape == (b3, s3, dout3)
    assert jnp.allclose(y3, y3_ref, atol=2e-3, rtol=2e-3)

    print("KERNEL_OK")
</pallas_src>

<mosaic_0001>
module attributes {stable_mosaic.version = 11 : i64} {
  func.func @_linear_kernel(%arg0: i32, %arg1: i32, %arg2: i32, %arg3: memref<16x128xbf16, #tpu.memory_space<vmem>>, %arg4: memref<128x128xbf16, #tpu.memory_space<vmem>>, %arg5: memref<1x128xf32, #tpu.memory_space<vmem>>, %arg6: memref<16x128xf32, #tpu.memory_space<vmem>>, %arg7: memref<16x128xf32, #tpu.memory_space<vmem>>) attributes {dimension_semantics = [#tpu.dimension_semantics<parallel>, #tpu.dimension_semantics<parallel>, #tpu.dimension_semantics<arbitrary>], iteration_bounds = array<i64: 1, 1, 1>, scalar_prefetch = 0 : i64, scratch_operands = 1 : i64, tpu.core_type = #tpu.core_type<tc>, window_params = [{transform_indices = @transform_0, window_bounds = array<i64: 16, 128>}, {transform_indices = @transform_1, window_bounds = array<i64: 128, 128>}, {transform_indices = @transform_2, window_bounds = array<i64: 1, 128>}, {transform_indices = @transform_3, window_bounds = array<i64: 16, 128>}]} {
    %c0_i32 = arith.constant 0 : i32
    %0 = arith.cmpi eq, %arg2, %c0_i32 : i32
    %1 = arith.extui %0 : i1 to i32
    %c0_i32_0 = arith.constant 0 : i32
    %2 = arith.cmpi ne, %1, %c0_i32_0 : i32
    scf.if %2 {
      %cst_10 = arith.constant 0.000000e+00 : f32
      %12 = vector.broadcast %cst_10 : f32 to vector<16x128xf32>
      %c0_11 = arith.constant 0 : index
      %c0_12 = arith.constant 0 : index
      %13 = vector.load %arg7[%c0_11, %c0_12] : memref<16x128xf32, #tpu.memory_space<vmem>>, vector<16x128xf32>
      tpu.vector_store %arg7[%c0_11, %c0_12], %12 {strides = array<i32>} : memref<16x128xf32, #tpu.memory_space<vmem>>, vector<16x128xf32>,
    } else {
    }
    %c0 = arith.constant 0 : index
    %c0_1 = arith.constant 0 : index
    %3 = vector.load %arg7[%c0, %c0_1] : memref<16x128xf32, #tpu.memory_space<vmem>>, vector<16x128xf32>
    %c0_2 = arith.constant 0 : index
    %c0_3 = arith.constant 0 : index
    %4 = vector.load %arg3[%c0_2, %c0_3] : memref<16x128xbf16, #tpu.memory_space<vmem>>, vector<16x128xbf16>
    %c0_4 = arith.constant 0 : index
    %c0_5 = arith.constant 0 : index
    %5 = vector.load %arg4[%c0_4, %c0_5] : memref<128x128xbf16, #tpu.memory_space<vmem>>, vector<128x128xbf16>
    %cst = arith.constant dense<0.000000e+00> : vector<16x128xf32>
    %6 = tpu.matmul %4, %5, %cst {dimension_numbers = #tpu.dot_dimension_numbers<[1], [0], [0], [1], [0, 0, 1, 1], [], []>} : vector<16x128xbf16>, vector<128x128xbf16>, vector<16x128xf32> -> vector<16x128xf32>
    %7 = arith.addf %3, %6 : vector<16x128xf32>
    %c0_6 = arith.constant 0 : index
    %c0_7 = arith.constant 0 : index
    %8 = vector.load %arg7[%c0_6, %c0_7] : memref<16x128xf32, #tpu.memory_space<vmem>>, vector<16x128xf32>
    tpu.vector_store %arg7[%c0_6, %c0_7], %7 {strides = array<i32>} : memref<16x128xf32, #tpu.memory_space<vmem>>, vector<16x128xf32>,
    %c0_i32_8 = arith.constant 0 : i32
    %9 = arith.cmpi eq, %arg2, %c0_i32_8 : i32
    %10 = arith.extui %9 : i1 to i32
    %c0_i32_9 = arith.constant 0 : i32
    %11 = arith.cmpi ne, %10, %c0_i32_9 : i32
    scf.if %11 {
      %c0_10 = arith.constant 0 : index
      %c0_11 = arith.constant 0 : index
      %12 = vector.load %arg7[%c0_10, %c0_11] : memref<16x128xf32, #tpu.memory_space<vmem>>, vector<16x128xf32>
      %c0_12 = arith.constant 0 : index
      %c0_13 = arith.constant 0 : index
      %13 = vector.load %arg5[%c0_12, %c0_13] : memref<1x128xf32, #tpu.memory_space<vmem>>, vector<1x128xf32>
      %14 = vector.broadcast %13 : vector<1x128xf32> to vector<16x128xf32>
      %15 = arith.addf %12, %14 : vector<16x128xf32>
      %c0_14 = arith.constant 0 : index
      %c0_15 = arith.constant 0 : index
      %16 = vector.load %arg6[%c0_14, %c0_15] : memref<16x128xf32, #tpu.memory_space<vmem>>, vector<16x128xf32>
      tpu.vector_store %arg6[%c0_14, %c0_15], %15 {strides = array<i32>} : memref<16x128xf32, #tpu.memory_space<vmem>>, vector<16x128xf32>,
    } else {
    }
    return
  }
  func.func @transform_0(%arg0: i32, %arg1: i32, %arg2: i32) -> (i32, i32) {
    %c0_i32 = arith.constant 0 : i32
    return %arg0, %arg2 : i32, i32
  }
  func.func @transform_1(%arg0: i32, %arg1: i32, %arg2: i32) -> (i32, i32) {
    %c0_i32 = arith.constant 0 : i32
    return %arg2, %arg1 : i32, i32
  }
  func.func @transform_2(%arg0: i32, %arg1: i32, %arg2: i32) -> (i32, i32) {
    %c0_i32 = arith.constant 0 : i32
    %c0_i32_0 = arith.constant 0 : i32
    return %c0_i32, %arg1 : i32, i32
  }
  func.func @transform_3(%arg0: i32, %arg1: i32, %arg2: i32) -> (i32, i32) {
    %c0_i32 = arith.constant 0 : i32
    return %arg0, %arg1 : i32, i32
  }
}

</mosaic_0001>

<bundles_post_ra>
// kernel: tpu_custom_call.1
= control target key start
LH: loop header
LB: loop body
LE: loop exit
PB: predicated region body
PF: predicated region fallthrough
CT: control target
= control target key end

     0   :  { %8 = vsyncpa [#allocation4], 0  ;;  %s348_s0 = inlined_call_operand.hbm [shape: bf16[16,128], index: 0, kind: input, shape index: {}]   ;;  %s349_s1 = inlined_call_operand.hbm [shape: bf16[128,128], index: 1, kind: input, shape index: {}]   ;;  %s350_s2 = inlined_call_operand.vmem [shape: f32[1,128], index: 2, kind: input, shape index: {}]   ;;  %s351_s3 = inlined_call_operand.hbm [shape: f32[16,128], index: 3, kind: output, shape index: {}]  }
   0x1   :  { %9 = vsyncpa [#allocation7], 0 }
   0x2   :  { %10 = vsyncpa [#allocation5], 0  ;;  %s15_s14 = sshll.u32 %s348_s0, 4  ;;  %s309_s15 = smov [#allocation3]   ;;  %s16_s14 = int_to_ptr.hbm [resolvable:$true] %s15_s14 }
   0x3   :  { %s17_s16 = sshll.u32 %s309_s15, 4  ;;  %s28_s19 = sshll.u32 %s349_s1, 4  ;;  %s18_s16 = int_to_ptr.vmem [resolvable:$true] %s17_s16  ;;  %s29_s19 = int_to_ptr.hbm [resolvable:$true] %s28_s19 }
   0x4   :  { %s310_s20 = smov 64   ;;  %s311_s21 = smov 4  }
   0x5   :  { %23 = dma.hbm_to_vmem [thread:$0]  %s16_s14, 128, %s18_s16, [#allocation4], %s310_s20, %s310_s20, %s311_s21  }
   0x6   :  { %s312_s22 = smov [#allocation6]  }
   0x7   :  { %s30_s23 = sshll.u32 %s312_s22, 4  ;;  %s31_s23 = int_to_ptr.vmem [resolvable:$true] %s30_s23 }
   0x8   :  { %36 = dma.hbm_to_vmem [thread:$0]  %s29_s19, 1024, %s31_s23, [#allocation7], %s310_s20, %s310_s20, %s311_s21  }
   0x9   :  { %303 = dma.done.wait [#allocation4], 128  }
   0xa   :  { %304 = vsyncadd [#allocation4], 4294967168 }
   0xb   :  { %305 = dma.done.wait [#allocation7], 1024  }
   0xc   :  { %306 = vsyncadd [#allocation7], 4294966272  ;;  %v222_v0 = vld [vmem:[#allocation6 + $0x38] sm:$0xff]  ;;  %v221_v1 = vld [vmem:[#allocation6 + $0x30] sm:$0xff]  ;;  %s313_s24 = smov [#allocation8]   ;;  %s164_s28 = sshll.u32 %s351_s3, 4  ;;  %s165_s28 = int_to_ptr.hbm [resolvable:$true] %s164_s28 }
   0xd   :  { %127 = vmatpush.bf16.msra.mxu0 %v222_v0  ;;  %v220_v2 = vld [vmem:[#allocation6 + $0x28] sm:$0xff]  ;;  %v219_v3 = vld [vmem:[#allocation6 + $0x20] sm:$0xff]  ;;  %v218_v4 = vld [vmem:[#allocation6 + $0x18] sm:$0xff]  ;;  %s162_s25 = sshll.u32 %s313_s24, 4  ;;  %s314_s29 = smov 128   ;;  %s163_s25 = int_to_ptr.vmem [resolvable:$true] %s162_s25 }
   0xe   :  { %v217_v5 = vld [vmem:[#allocation6 + $0x10] sm:$0xff]  ;;  %v216_v6 = vld [vmem:[#allocation6 + $0x8] sm:$0xff]  ;;  %v215_v7 = vld [vmem:[#allocation6] sm:$0xff]  ;;  %s315_s30 = smov 8  }
   0xf   :  { %v214_v8 = vld [vmem:[#allocation3] sm:$0xff] }
  0x10   :  { %v230_v9 = vld [vmem:[%s350_s2] ss:$0 sm:$0xff] }
  0x11   :  { %128 = vmatpush.bf16.msra.mxu0 %v221_v1 }
  0x15   :  { %129 = vmatpush.bf16.msra.mxu0 %v220_v2 }
  0x19   :  { %130 = vmatpush.bf16.msra.mxu0 %v219_v3 }
  0x1d   :  { %131 = vmatpush.bf16.msra.mxu0 %v218_v4 }
  0x21   :  { %132 = vmatpush.bf16.msra.mxu0 %v217_v5 }
  0x25   :  { %133 = vmatpush.bf16.msra.mxu0 %v216_v6 }
  0x29   :  { %134 = vmatpush.bf16.msra.mxu0 %v215_v7 }
  0x2c   :  { %135 = vmatmul.bf16.vlgmr.msra.gmra.mxu0 %v214_v8 }
  0xa9   :  { %v136_v10 = vpop.f32.mrf.mxu0 }
  0xaa   :  { %v154_v11 = vadd.f32 %v230_v9, %v136_v10 }
  0xac   :  { %156 = vst [vmem:[#allocation8] sm:$0xff] %v154_v11 }
  0xb1   :  { %v138_v12 = vpop.f32.mrf.mxu0 }
  0xb2   :  { %v155_v13 = vadd.f32 %v230_v9, %v138_v12 }
  0xb4   :  { %157 = vst [vmem:[#allocation8 + $0x8] sm:$0xff] %v155_v13 }
  0xb5   :  { %170 = dma.vmem_to_hbm [thread:$0]  %s163_s25, 256, %s165_s28, [#allocation5], %s314_s29, %s314_s29, %s315_s30  }
  0xb6   :  { %307 = dma.done.wait [#allocation5], 256  }
  0xb7   :  { %308 = vsyncadd [#allocation5], 4294967040 }
  0xb8   :  { %175 = vsyncpa [#allocation4], 1 }
  0xb9   :  { %176 = vsyncpa [#allocation7], 1 }
  0xba   :  { %177 = vsyncpa [#allocation5], 1 }

</bundles_post_ra>
